<compile_context>
chip_gen: v7x
topology: tpu7x:2x2x1
jax: 0.10.0
libtpu: 0.0.40
codegen_flags: <defaults>
</compile_context>

<pallas_src>
import functools

import jax
import jax.numpy as jnp
from jax.experimental import pallas as pl
from jax.experimental.pallas import tpu as pltpu


def _mine_kernel(tq_ref, tk_ref, sq_q_ref, sq_k_ref, xq_ref, xk_ref,
                 ap_ref, an_ref, ap2_acc, an2_acc,
                 *, n_valid, tk_size, gram_dtype):
    k = pl.program_id(1)

    @pl.when(k == 0)
    def _():
        ap2_acc[...] = jnp.full(ap2_acc.shape, -1e30, jnp.float32)
        an2_acc[...] = jnp.full(an2_acc.shape, 1e30, jnp.float32)

    # Gram tile on the MXU (bf16 by default, f32 accumulation).  Contraction
    # is on the feature axis directly -> no explicit transpose feeds the MXU.
    xq = xq_ref[...].astype(gram_dtype)                         # (TM, D)
    xk = xk_ref[...].astype(gram_dtype)                         # (TK, D)
    gram = jax.lax.dot_general(
        xq, xk,
        dimension_numbers=(((1,), (1,)), ((), ())),
        preferred_element_type=jnp.float32)                     # (TM, TK)

    # Squared pairwise distances; norms were hoisted to the wrapper.
    dist2 = sq_q_ref[...] + sq_k_ref[...] - 2.0 * gram          # (TM, TK)

    # Same-label mask: (TM,1) query labels vs (1,TK) key labels.
    mask_same = tq_ref[...] == tk_ref[...]                      # (TM, TK)

    # Validity of key columns (mask out zero-padded columns).
    col = k * tk_size + jax.lax.broadcasted_iota(jnp.int32, dist2.shape, 1)
    valid = col < n_valid

    # Hardest positive = max dist^2 over same-label valid columns (self
    # included, as in the reference).  Hardest negative = min dist^2 over
    # different-label valid columns.
    pos = jnp.where(mask_same & valid, dist2, -1e30)
    neg = jnp.where(mask_same | (~valid), 1e30, dist2)

    # Deferred reduction: fold 128-lane slices into the (TM,128) accumulators
    # with pure VPU elementwise max/min (no per-step XLU reduce).
    ap2 = ap2_acc[...]
    an2 = an2_acc[...]
    for s in range(tk_size // 128):
        sl = slice(s * 128, (s + 1) * 128)
        ap2 = jnp.maximum(ap2, pos[:, sl])
        an2 = jnp.minimum(an2, neg[:, sl])
    ap2_acc[...] = ap2
    an2_acc[...] = an2

    @pl.when(k == pl.num_programs(1) - 1)
    def _():
        # Single 128->1 cross-lane reduce + clamp + sqrt (O(N) total EUP work).
        # Note: reference clamps per-element before sqrt; clamping the reduced
        # squared value differs by at most sqrt(1e-12).
        ap_ref[...] = jnp.sqrt(jnp.maximum(
            jnp.max(ap2_acc[...], axis=1, keepdims=True), 1e-12))
        an_ref[...] = jnp.sqrt(jnp.maximum(
            jnp.min(an2_acc[...], axis=1, keepdims=True), 1e-12))


def _pick_tiles(n_pad, d, feat_bytes, budget_bytes=44 * 1024 * 1024):
    """Footprint-aware tile picker (tiles are multiples of 128 dividing n_pad)."""
    cands = [t for t in (1024, 512, 256, 128) if n_pad % t == 0]

    def footprint(tm, tk):
        feats = 2 * (tm + tk) * d * feat_bytes   # double-buffered feature tiles
        accs = 2 * tm * 128 * 4                  # (tm,128) mining accumulators
        temps = 6 * tm * tk * 4                  # gram/dist2/pos/neg/mask temporaries
        small = 4 * (tm + tk) * 4                # labels + squared norms
        return feats + accs + temps + small

    # Largest tm that (a) leaves >=2 row tiles when possible (v7x dual-TC) and
    # (b) fits with the smallest tk.  Then grow tk as far as the budget allows
    # (shrink tk before tm when constrained).
    tm = cands[-1]
    for t in cands:
        if n_pad >= 256 and n_pad // t < 2:
            continue
        if footprint(t, cands[-1]) <= budget_bytes:
            tm = t
            break
    tk = cands[-1]
    for t in cands:
        if footprint(tm, t) <= budget_bytes:
            tk = t
            break
    return tm, tk


def ori_triplet_loss(inputs, targets, margin=0.3, bf16_gram=True):
    """inputs: (N, D) float array; targets: (N,) int array. Returns (loss, correct).

    bf16_gram=True (default) uses the native bf16 MXU path with f32
    accumulation; distances are perturbed by ~1e-2 relative, which can flip
    near-tied hardest-pair choices.  Use bf16_gram=False for a bit-close match
    to the f32 PyTorch reference.
    """
    n, d = inputs.shape
    t = targets.astype(jnp.int32)

    # Pad N to a multiple of 128 (lane granularity); padded key columns are
    # masked inside the kernel, padded query rows are sliced off afterwards.
    n_pad = ((n + 127) // 128) * 128
    x_pad = jnp.pad(inputs, ((0, n_pad - n), (0, 0)))            # native dtype
    t_pad = jnp.pad(t, (0, n_pad - n))

    # Hoisted squared norms: one fused O(N*D) pass in the wrapper.
    sq = jnp.sum(jnp.square(x_pad.astype(jnp.float32)), axis=1)
    sq_col = sq.reshape(n_pad, 1)
    sq_row = sq.reshape(1, n_pad)
    t_col = t_pad.reshape(n_pad, 1)
    t_row = t_pad.reshape(1, n_pad)

    feat_bytes = jnp.dtype(inputs.dtype).itemsize
    tm, tk = _pick_tiles(n_pad, d, feat_bytes)
    n_i, n_k = n_pad // tm, n_pad // tk

    kernel = functools.partial(
        _mine_kernel, n_valid=n, tk_size=tk,
        gram_dtype=jnp.bfloat16 if bf16_gram else jnp.float32)

    dist_ap, dist_an = pl.pallas_call(
        kernel,
        out_shape=(
            jax.ShapeDtypeStruct((n_pad, 1), jnp.float32),
            jax.ShapeDtypeStruct((n_pad, 1), jnp.float32),
        ),
        grid_spec=pltpu.PrefetchScalarGridSpec(
            num_scalar_prefetch=0,
            grid=(n_i, n_k),
            in_specs=[
                pl.BlockSpec((tm, 1), lambda i, k: (i, 0)),   # query labels
                pl.BlockSpec((1, tk), lambda i, k: (0, k)),   # key labels
                pl.BlockSpec((tm, 1), lambda i, k: (i, 0)),   # query sq norms
                pl.BlockSpec((1, tk), lambda i, k: (0, k)),   # key sq norms
                pl.BlockSpec((tm, d), lambda i, k: (i, 0)),   # query features
                pl.BlockSpec((tk, d), lambda i, k: (k, 0)),   # key features
            ],
            out_specs=[
                pl.BlockSpec((tm, 1), lambda i, k: (i, 0)),
                pl.BlockSpec((tm, 1), lambda i, k: (i, 0)),
            ],
            scratch_shapes=[
                pltpu.VMEM((tm, 128), jnp.float32),   # hardest-positive dist^2
                pltpu.VMEM((tm, 128), jnp.float32),   # hardest-negative dist^2
            ],
        ),
        compiler_params=pltpu.CompilerParams(
            dimension_semantics=("parallel", "arbitrary"),
            vmem_limit_bytes=56 * 1024 * 1024,   # < 64 MiB physical on v7x
        ),
    )(t_col, t_row, sq_col, sq_row, x_pad, x_pad)

    dist_ap = dist_ap[:n, 0]
    dist_an = dist_an[:n, 0]

    # Tiny O(N) epilogue: MarginRankingLoss(margin)(dist_an, dist_ap, y=1),
    # mean reduction, plus the correct count.
    loss = jnp.mean(jnp.maximum(dist_ap - dist_an + jnp.float32(margin), 0.0))
    correct = jnp.sum((dist_an >= dist_ap).astype(jnp.int32))
    return loss, correct


def _reference(inputs, targets, margin=0.3):
    # Pure-JAX reference mirroring the PyTorch module.
    x = inputs.astype(jnp.float32)
    sq = jnp.sum(x**2, axis=1, keepdims=True)
    dist = sq + sq.T - 2.0 * x @ x.T
    dist = jnp.sqrt(jnp.maximum(dist, 1e-12))
    mask = targets[:, None] == targets[None, :]
    dist_ap = jnp.max(jnp.where(mask, dist, -jnp.inf), axis=1)
    dist_an = jnp.min(jnp.where(mask, jnp.inf, dist), axis=1)
    loss = jnp.mean(jnp.maximum(dist_ap - dist_an + margin, 0.0))
    correct = jnp.sum((dist_an >= dist_ap).astype(jnp.int32))
    return loss, correct


if __name__ == "__main__":
    key = jax.random.PRNGKey(0)
    n, d = 8, 32  # batch of 8 features with dim 32
    feats = jax.random.normal(key, (n, d), dtype=jnp.float32)
    # 4 identities, 2 samples each -> every sample has a positive and a negative.
    labels = jnp.array([0, 0, 1, 1, 2, 2, 3, 3], dtype=jnp.int32)

    ref_loss, ref_correct = _reference(feats, labels, margin=0.3)

    # Exact path (f32 gram): bit-close to the PyTorch reference.
    loss32, correct32 = ori_triplet_loss(feats, labels, margin=0.3,
                                         bf16_gram=False)
    jax.block_until_ready((loss32, correct32))
    assert jnp.allclose(loss32, ref_loss, atol=1e-4), (loss32, ref_loss)
    assert int(correct32) == int(ref_correct), (correct32, ref_correct)

    # Fast path (default, bf16 MXU gram): small numeric perturbation expected.
    loss_bf16, correct_bf16 = ori_triplet_loss(feats, labels, margin=0.3)
    jax.block_until_ready((loss_bf16, correct_bf16))
    assert jnp.allclose(loss_bf16, ref_loss, atol=5e-2), (loss_bf16, ref_loss)

    print("KERNEL_OK")
</pallas_src>

<mosaic_0001>
module attributes {stable_mosaic.version = 11 : i64} {
  func.func @_mine_kernel(%arg0: i32, %arg1: i32, %arg2: memref<128x1xi32, #tpu.memory_space<vmem>>, %arg3: memref<1x128xi32, #tpu.memory_space<vmem>>, %arg4: memref<128x1xf32, #tpu.memory_space<vmem>>, %arg5: memref<1x128xf32, #tpu.memory_space<vmem>>, %arg6: memref<128x32xf32, #tpu.memory_space<vmem>>, %arg7: memref<128x32xf32, #tpu.memory_space<vmem>>, %arg8: memref<128x1xf32, #tpu.memory_space<vmem>>, %arg9: memref<128x1xf32, #tpu.memory_space<vmem>>, %arg10: memref<128x128xf32, #tpu.memory_space<vmem>>, %arg11: memref<128x128xf32, #tpu.memory_space<vmem>>) attributes {dimension_semantics = [#tpu.dimension_semantics<parallel>, #tpu.dimension_semantics<arbitrary>], iteration_bounds = array<i64: 1, 1>, scalar_prefetch = 0 : i64, scratch_operands = 2 : i64, tpu.core_type = #tpu.core_type<tc>, window_params = [{transform_indices = @transform_0, window_bounds = array<i64: 128, 1>}, {transform_indices = @transform_1, window_bounds = array<i64: 1, 128>}, {transform_indices = @transform_2, window_bounds = array<i64: 128, 1>}, {transform_indices = @transform_3, window_bounds = array<i64: 1, 128>}, {transform_indices = @transform_4, window_bounds = array<i64: 128, 32>}, {transform_indices = @transform_5, window_bounds = array<i64: 128, 32>}, {transform_indices = @transform_6, window_bounds = array<i64: 128, 1>}, {transform_indices = @transform_7, window_bounds = array<i64: 128, 1>}]} {
    %c0_i32 = arith.constant 0 : i32
    %0 = arith.cmpi eq, %arg1, %c0_i32 : i32
    %1 = arith.extui %0 : i1 to i32
    %c0_i32_0 = arith.constant 0 : i32
    %2 = arith.cmpi ne, %1, %c0_i32_0 : i32
    scf.if %2 {
      %cst_26 = arith.constant -1.000000e+30 : f32
      %41 = vector.broadcast %cst_26 : f32 to vector<128x128xf32>
      %c0_27 = arith.constant 0 : index
      %c0_28 = arith.constant 0 : index
      %42 = vector.load %arg10[%c0_27, %c0_28] : memref<128x128xf32, #tpu.memory_space<vmem>>, vector<128x128xf32>
      tpu.vector_store %arg10[%c0_27, %c0_28], %41 {strides = array<i32>} : memref<128x128xf32, #tpu.memory_space<vmem>>, vector<128x128xf32>,
      %cst_29 = arith.constant 1.000000e+30 : f32
      %43 = vector.broadcast %cst_29 : f32 to vector<128x128xf32>
      %c0_30 = arith.constant 0 : index
      %c0_31 = arith.constant 0 : index
      %44 = vector.load %arg11[%c0_30, %c0_31] : memref<128x128xf32, #tpu.memory_space<vmem>>, vector<128x128xf32>
      tpu.vector_store %arg11[%c0_30, %c0_31], %43 {strides = array<i32>} : memref<128x128xf32, #tpu.memory_space<vmem>>, vector<128x128xf32>,
    } else {
    }
    %c0 = arith.constant 0 : index
    %c0_1 = arith.constant 0 : index
    %3 = vector.load %arg6[%c0, %c0_1] : memref<128x32xf32, #tpu.memory_space<vmem>>, vector<128x32xf32>
    %c0_2 = arith.constant 0 : index
    %c0_3 = arith.constant 0 : index
    %4 = vector.load %arg7[%c0_2, %c0_3] : memref<128x32xf32, #tpu.memory_space<vmem>>, vector<128x32xf32>
    %cst = arith.constant dense<0.000000e+00> : vector<128x128xf32>
    %5 = tpu.matmul %3, %4, %cst {dimension_numbers = #tpu.dot_dimension_numbers<[1], [1], [0], [0], [0, 0, 1, 0], [], []>} : vector<128x32xf32>, vector<128x32xf32>, vector<128x128xf32> -> vector<128x128xf32>
    %c0_4 = arith.constant 0 : index
    %c0_5 = arith.constant 0 : index
    %6 = vector.load %arg4[%c0_4, %c0_5] : memref<128x1xf32, #tpu.memory_space<vmem>>, vector<128x1xf32>
    %c0_6 = arith.constant 0 : index
    %c0_7 = arith.constant 0 : index
    %7 = vector.load %arg5[%c0_6, %c0_7] : memref<1x128xf32, #tpu.memory_space<vmem>>, vector<1x128xf32>
    %8 = vector.broadcast %6 : vector<128x1xf32> to vector<128x128xf32>
    %9 = vector.broadcast %7 : vector<1x128xf32> to vector<128x128xf32>
    %10 = arith.addf %8, %9 : vector<128x128xf32>
    %cst_8 = arith.constant 2.000000e+00 : f32
    %11 = vector.broadcast %cst_8 : f32 to vector<128x128xf32>
    %12 = arith.mulf %11, %5 : vector<128x128xf32>
    %13 = arith.subf %10, %12 : vector<128x128xf32>
    %c0_9 = arith.constant 0 : index
    %c0_10 = arith.constant 0 : index
    %14 = vector.load %arg2[%c0_9, %c0_10] : memref<128x1xi32, #tpu.memory_space<vmem>>, vector<128x1xi32>
    %c0_11 = arith.constant 0 : index
    %c0_12 = arith.constant 0 : index
    %15 = vector.load %arg3[%c0_11, %c0_12] : memref<1x128xi32, #tpu.memory_space<vmem>>, vector<1x128xi32>
    %16 = vector.broadcast %14 : vector<128x1xi32> to vector<128x128xi32>
    %17 = vector.broadcast %15 : vector<1x128xi32> to vector<128x128xi32>
    %18 = arith.cmpi eq, %16, %17 : vector<128x128xi32>
    %c128_i32 = arith.constant 128 : i32
    %19 = arith.muli %arg1, %c128_i32 : i32
    %20 = tpu.iota {dimensions = array<i32: 1>} : vector<128x128xi32>
    %21 = vector.broadcast %19 : i32 to vector<128x128xi32>
    %22 = arith.addi %21, %20 : vector<128x128xi32>
    %c8_i32 = arith.constant 8 : i32
    %23 = vector.broadcast %c8_i32 : i32 to vector<128x128xi32>
    %24 = arith.cmpi slt, %22, %23 : vector<128x128xi32>
    %25 = arith.andi %18, %24 : vector<128x128xi1>
    %cst_13 = arith.constant -1.000000e+30 : f32
    %26 = vector.broadcast %cst_13 : f32 to vector<128x128xf32>
    %27 = arith.select %25, %13, %26 : vector<128x128xi1>, vector<128x128xf32>
    %cst_14 = arith.constant dense<true> : vector<128x128xi1>
    %28 = arith.xori %24, %cst_14 : vector<128x128xi1>
    %29 = arith.ori %18, %28 : vector<128x128xi1>
    %cst_15 = arith.constant 1.000000e+30 : f32
    %30 = vector.broadcast %cst_15 : f32 to vector<128x128xf32>
    %31 = arith.select %29, %30, %13 : vector<128x128xi1>, vector<128x128xf32>
    %c0_16 = arith.constant 0 : index
    %c0_17 = arith.constant 0 : index
    %32 = vector.load %arg10[%c0_16, %c0_17] : memref<128x128xf32, #tpu.memory_space<vmem>>, vector<128x128xf32>
    %c0_18 = arith.constant 0 : index
    %c0_19 = arith.constant 0 : index
    %33 = vector.load %arg11[%c0_18, %c0_19] : memref<128x128xf32, #tpu.memory_space<vmem>>, vector<128x128xf32>
    %34 = arith.maximumf %32, %27 : vector<128x128xf32>
    %35 = arith.minimumf %33, %31 : vector<128x128xf32>
    %c0_20 = arith.constant 0 : index
    %c0_21 = arith.constant 0 : index
    %36 = vector.load %arg10[%c0_20, %c0_21] : memref<128x128xf32, #tpu.memory_space<vmem>>, vector<128x128xf32>
    tpu.vector_store %arg10[%c0_20, %c0_21], %34 {strides = array<i32>} : memref<128x128xf32, #tpu.memory_space<vmem>>, vector<128x128xf32>,
    %c0_22 = arith.constant 0 : index
    %c0_23 = arith.constant 0 : index
    %37 = vector.load %arg11[%c0_22, %c0_23] : memref<128x128xf32, #tpu.memory_space<vmem>>, vector<128x128xf32>
    tpu.vector_store %arg11[%c0_22, %c0_23], %35 {strides = array<i32>} : memref<128x128xf32, #tpu.memory_space<vmem>>, vector<128x128xf32>,
    %c0_i32_24 = arith.constant 0 : i32
    %38 = arith.cmpi eq, %arg1, %c0_i32_24 : i32
    %39 = arith.extui %38 : i1 to i32
    %c0_i32_25 = arith.constant 0 : i32
    %40 = arith.cmpi ne, %39, %c0_i32_25 : i32
    scf.if %40 {
      %c0_26 = arith.constant 0 : index
      %c0_27 = arith.constant 0 : index
      %41 = vector.load %arg10[%c0_26, %c0_27] : memref<128x128xf32, #tpu.memory_space<vmem>>, vector<128x128xf32>
      %cst_28 = arith.constant dense<0xFF800000> : vector<128xf32>
      %42 = vector.multi_reduction <maximumf>, %41, %cst_28 [1] : vector<128x128xf32> to vector<128xf32>
      %43 = vector.shape_cast %42 : vector<128xf32> to vector<128x1xf32>
      %cst_29 = arith.constant 9.99999996E-13 : f32
      %44 = vector.broadcast %cst_29 : f32 to vector<128x1xf32>
      %45 = arith.maximumf %43, %44 : vector<128x1xf32>
      %46 = math.sqrt %45 : vector<128x1xf32>
      %c0_30 = arith.constant 0 : index
      %c0_31 = arith.constant 0 : index
      %47 = vector.load %arg8[%c0_30, %c0_31] : memref<128x1xf32, #tpu.memory_space<vmem>>, vector<128x1xf32>
      tpu.vector_store %arg8[%c0_30, %c0_31], %46 {strides = array<i32>} : memref<128x1xf32, #tpu.memory_space<vmem>>, vector<128x1xf32>,
      %c0_32 = arith.constant 0 : index
      %c0_33 = arith.constant 0 : index
      %48 = vector.load %arg11[%c0_32, %c0_33] : memref<128x128xf32, #tpu.memory_space<vmem>>, vector<128x128xf32>
      %cst_34 = arith.constant dense<0x7F800000> : vector<128xf32>
      %49 = vector.multi_reduction <minimumf>, %48, %cst_34 [1] : vector<128x128xf32> to vector<128xf32>
      %50 = vector.shape_cast %49 : vector<128xf32> to vector<128x1xf32>
      %cst_35 = arith.constant 9.99999996E-13 : f32
      %51 = vector.broadcast %cst_35 : f32 to vector<128x1xf32>
      %52 = arith.maximumf %50, %51 : vector<128x1xf32>
      %53 = math.sqrt %52 : vector<128x1xf32>
      %c0_36 = arith.constant 0 : index
      %c0_37 = arith.constant 0 : index
      %54 = vector.load %arg9[%c0_36, %c0_37] : memref<128x1xf32, #tpu.memory_space<vmem>>, vector<128x1xf32>
      tpu.vector_store %arg9[%c0_36, %c0_37], %53 {strides = array<i32>} : memref<128x1xf32, #tpu.memory_space<vmem>>, vector<128x1xf32>,
    } else {
    }
    return
  }
  func.func @transform_0(%arg0: i32, %arg1: i32) -> (i32, i32) {
    %c0_i32 = arith.constant 0 : i32
    %c0_i32_0 = arith.constant 0 : i32
    return %arg0, %c0_i32 : i32, i32
  }
  func.func @transform_1(%arg0: i32, %arg1: i32) -> (i32, i32) {
    %c0_i32 = arith.constant 0 : i32
    %c0_i32_0 = arith.constant 0 : i32
    return %c0_i32, %arg1 : i32, i32
  }
  func.func @transform_2(%arg0: i32, %arg1: i32) -> (i32, i32) {
    %c0_i32 = arith.constant 0 : i32
    %c0_i32_0 = arith.constant 0 : i32
    return %arg0, %c0_i32 : i32, i32
  }
  func.func @transform_3(%arg0: i32, %arg1: i32) -> (i32, i32) {
    %c0_i32 = arith.constant 0 : i32
    %c0_i32_0 = arith.constant 0 : i32
    return %c0_i32, %arg1 : i32, i32
  }
  func.func @transform_4(%arg0: i32, %arg1: i32) -> (i32, i32) {
    %c0_i32 = arith.constant 0 : i32
    %c0_i32_0 = arith.constant 0 : i32
    return %arg0, %c0_i32 : i32, i32
  }
  func.func @transform_5(%arg0: i32, %arg1: i32) -> (i32, i32) {
    %c0_i32 = arith.constant 0 : i32
    %c0_i32_0 = arith.constant 0 : i32
    return %arg1, %c0_i32 : i32, i32
  }
  func.func @transform_6(%arg0: i32, %arg1: i32) -> (i32, i32) {
    %c0_i32 = arith.constant 0 : i32
    %c0_i32_0 = arith.constant 0 : i32
    return %arg0, %c0_i32 : i32, i32
  }
  func.func @transform_7(%arg0: i32, %arg1: i32) -> (i32, i32) {
    %c0_i32 = arith.constant 0 : i32
    %c0_i32_0 = arith.constant 0 : i32
    return %arg0, %c0_i32 : i32, i32
  }
}

</mosaic_0001>

<bundles_post_ra>
// kernel: tpu_custom_call.1
= control target key start
LH: loop header
LB: loop body
LE: loop exit
PB: predicated region body
PF: predicated region fallthrough
CT: control target
= control target key end

     0   :  { %vm93_vm0 = vcmask 261120   ;;  %v1388_v3 = vmov 0   ;;  %vm1389_vm5 = vmmov 1   ;;  %s2388_s5 = inlined_call_operand.vmem [shape: f32[128,32], index: 5, kind: input, shape index: {}]   ;;  %s2389_s2 = inlined_call_operand.vmem [shape: f32[128,1], index: 2, kind: input, shape index: {}]   ;;  %s2390_s4 = inlined_call_operand.vmem [shape: f32[128,32], index: 4, kind: input, shape index: {}]   ;;  %s2391_s0 = inlined_call_operand.vmem [shape: s32[128,1], index: 0, kind: input, shape index: {}]   ;;  %s2392_s3 = inlined_call_operand.vmem [shape: f32[1,128], index: 3, kind: input, shape index: {}]   ;;  %s2393_s1 = inlined_call_operand.vmem [shape: s32[1,128], index: 1, kind: input, shape index: {}]   ;;  %s2394_s6 = inlined_call_operand.vmem [shape: f32[128,1], index: 6, kind: output, shape index: {0}]   ;;  %s2395_s7 = inlined_call_operand.vmem [shape: f32[128,1], index: 7, kind: output, shape index: {1}]  }
   0x1   :  { %v77_v0 = vld [vmem:[%s2388_s5] sm:$0xff]  ;;  %v78_v1 = vld [vmem:[%s2388_s5 + $0x8] sm:$0xff]  ;;  %vm1438_vm1 = vmpackc.low %vm93_vm0, %vm93_vm0  ;;  %1323 = vset.pattern.permute.xlu1 %v1388_v3  ;;  %1322 = vset.pattern.permute.xlu0 %v1388_v3 }
   0x2   :  { %v1256_v4 = vpack.c.bf16 %v78_v1, %v77_v0  ;;  %v79_v5 = vld [vmem:[%s2388_s5 + $0x10] sm:$0xff]  ;;  %v80_v6 = vld [vmem:[%s2388_s5 + $0x18] sm:$0xff]  ;;  %v81_v9 = vld [vmem:[%s2388_s5 + $0x20] sm:$0xff] }
   0x3   :  { %v1262_v7 = vpack.c.bf16 %v80_v6, %v79_v5  ;;  %v337_v8 = vld [vmem:[%s2389_s2 + $0x10] sm:$0xff]  ;;  %v82_v10 = vld [vmem:[%s2388_s5 + $0x28] sm:$0xff]  ;;  %v335_v11 = vld [vmem:[%s2389_s2] sm:$0xff] }
   0x4   :  { %1258 = vmatprep.subr.msk.bf16.mxu0 %vm1438_vm1, %v1256_v4  ;;  %1304 = vmatprep.subr.msk.bf16.mxu1 %vm1438_vm1, %v1256_v4  ;;  %v338_v12 = vld [vmem:[%s2389_s2 + $0x18] sm:$0xff]  ;;  %v336_v13 = vld [vmem:[%s2389_s2 + $0x8] sm:$0xff]  ;;  %v61_v14 = vld [vmem:[%s2390_s4] sm:$0xff]  ;;  %v1268_v15 = vpack.c.bf16 %v82_v10, %v81_v9 }
   0x5   :  { %1261 = vmatpush3.bf16.xpose.msk.msra.mxu0 %vm1438_vm1, %v1256_v4  ;;  %1312 = vmatpush3.bf16.xpose.msk.msra.mxu1 %vm1438_vm1, %v1256_v4  ;;  %v69_v16 = vld [vmem:[%s2390_s4 + $0x40] sm:$0xff]  ;;  %v340_v17 = vld [vmem:[%s2389_s2 + $0x28] sm:$0xff]  ;;  %v83_v19 = vld [vmem:[%s2388_s5 + $0x30] sm:$0xff] }
   0x6   :  { %1264 = vmatprep.subr.msk.bf16.mxu0 %vm1438_vm1, %v1262_v7  ;;  %1305 = vmatprep.subr.msk.bf16.mxu1 %vm1438_vm1, %v1262_v7  ;;  %v339_v18 = vld [vmem:[%s2389_s2 + $0x20] sm:$0xff]  ;;  %v84_v20 = vld [vmem:[%s2388_s5 + $0x38] sm:$0xff]  ;;  %v341_v22 = vld [vmem:[%s2389_s2 + $0x30] sm:$0xff] }
   0x7   :  { %364 = vperm.xlu1 %1323, %v337_v8   ;;  %354 = vperm.xlu0 %1322, %v335_v11   ;;  %v342_v21 = vld [vmem:[%s2389_s2 + $0x38] sm:$0xff]  ;;  %v1274_v23 = vpack.c.bf16 %v84_v20, %v83_v19  ;;  %v344_v24 = vld [vmem:[%s2389_s2 + $0x48] sm:$0xff]  ;;  %v343_v25 = vld [vmem:[%s2389_s2 + $0x40] sm:$0xff] }
   0x8   :  { %1232 = vmatprep.mubr.msk.f32.mxu0 %vm93_vm0, %v61_v14  ;;  %1244 = vmatprep.mubr.msk.f32.mxu1 %vm93_vm0, %v69_v16  ;;  %v85_v26 = vld [vmem:[%s2388_s5 + $0x40] sm:$0xff]  ;;  %v86_v27 = vld [vmem:[%s2388_s5 + $0x48] sm:$0xff]  ;;  %v346_v28 = vld [vmem:[%s2389_s2 + $0x58] sm:$0xff] }
   0x9   :  { %v345_v29 = vld [vmem:[%s2389_s2 + $0x50] sm:$0xff]  ;;  %v1280_v30 = vpack.c.bf16 %v86_v27, %v85_v26  ;;  %v348_v31 = vld [vmem:[%s2389_s2 + $0x68] sm:$0xff]  ;;  %v347_v32 = vld [vmem:[%s2389_s2 + $0x60] sm:$0xff] }
   0xa   :  { %v87_v33 = vld [vmem:[%s2388_s5 + $0x50] sm:$0xff]  ;;  %v88_v34 = vld [vmem:[%s2388_s5 + $0x58] sm:$0xff]  ;;  %v487_v38 = vld [vmem:[%s2391_s0 + $0x8] sm:$0xff] }
   0xb   :  { %369 = vperm.xlu1 %1323, %v338_v12   ;;  %359 = vperm.xlu0 %1322, %v336_v13   ;;  %v350_v35 = vld [vmem:[%s2389_s2 + $0x78] sm:$0xff]  ;;  %v349_v36 = vld [vmem:[%s2389_s2 + $0x70] sm:$0xff]  ;;  %v1286_v37 = vpack.c.bf16 %v88_v34, %v87_v33  ;;  %v486_v39 = vld [vmem:[%s2391_s0] sm:$0xff] }
   0xc   :  { %v89_v40 = vld [vmem:[%s2388_s5 + $0x60] sm:$0xff]  ;;  %v90_v41 = vld [vmem:[%s2388_s5 + $0x68] sm:$0xff]  ;;  %v489_v42 = vld [vmem:[%s2391_s0 + $0x18] sm:$0xff] }
   0xd   :  { %1267 = vmatpush3.bf16.xpose.msk.msra.mxu0 %vm1438_vm1, %v1262_v7  ;;  %1313 = vmatpush3.bf16.xpose.msk.msra.mxu1 %vm1438_vm1, %v1262_v7  ;;  %v488_v43 = vld [vmem:[%s2391_s0 + $0x10] sm:$0xff]  ;;  %v1292_v44 = vpack.c.bf16 %v90_v41, %v89_v40  ;;  %v491_v45 = vld [vmem:[%s2391_s0 + $0x28] sm:$0xff]  ;;  %v490_v46 = vld [vmem:[%s2391_s0 + $0x20] sm:$0xff] }
   0xe   :  { %1270 = vmatprep.subr.msk.bf16.mxu0 %vm1438_vm1, %v1268_v15  ;;  %1306 = vmatprep.subr.msk.bf16.mxu1 %vm1438_vm1, %v1268_v15  ;;  %v91_v47 = vld [vmem:[%s2388_s5 + $0x70] sm:$0xff]  ;;  %v92_v48 = vld [vmem:[%s2388_s5 + $0x78] sm:$0xff]  ;;  %v495_v52 = vld [vmem:[%s2391_s0 + $0x48] sm:$0xff] }
   0xf   :  { %379 = vperm.xlu1 %1323, %v340_v17   ;;  %374 = vperm.xlu0 %1322, %v339_v18   ;;  %v493_v49 = vld [vmem:[%s2391_s0 + $0x38] sm:$0xff]  ;;  %v492_v50 = vld [vmem:[%s2391_s0 + $0x30] sm:$0xff]  ;;  %v1298_v51 = vpack.c.bf16 %v92_v48, %v91_v47  ;;  %v494_v53 = vld [vmem:[%s2391_s0 + $0x40] sm:$0xff] }
  0x10   :  { %v497_v54 = vld [vmem:[%s2391_s0 + $0x58] sm:$0xff]  ;;  %v496_v55 = vld [vmem:[%s2391_s0 + $0x50] sm:$0xff]  ;;  %v499_v56 = vld [vmem:[%s2391_s0 + $0x68] sm:$0xff] }
  0x11   :  { %v498_v57 = vld [vmem:[%s2391_s0 + $0x60] sm:$0xff]  ;;  %v501_v58 = vld [vmem:[%s2391_s0 + $0x78] sm:$0xff]  ;;  %v62_v59 = vld [vmem:[%s2390_s4 + $0x8] sm:$0xff] }
  0x12   :  { %v70_v60 = vld [vmem:[%s2390_s4 + $0x48] sm:$0xff]  ;;  %v63_v61 = vld [vmem:[%s2390_s4 + $0x10] sm:$0xff]  ;;  %v64_v0 = vld [vmem:[%s2390_s4 + $0x18] sm:$0xff] }
  0x13   :  { %389 = vperm.xlu1 %1323, %v342_v21   ;;  %384 = vperm.xlu0 %1322, %v341_v22   ;;  %v71_v62 = vld [vmem:[%s2390_s4 + $0x50] sm:$0xff]  ;;  %v72_v1 = vld [vmem:[%s2390_s4 + $0x58] sm:$0xff]  ;;  %v65_v2 = vld [vmem:[%s2390_s4 + $0x20] sm:$0xff] }
  0x14   :  { %v500_v63 = vld [vmem:[%s2391_s0 + $0x70] sm:$0xff]  ;;  %v73_v3 = vld [vmem:[%s2390_s4 + $0x60] sm:$0xff]  ;;  %v66_v4 = vld [vmem:[%s2390_s4 + $0x28] sm:$0xff] }
  0x15   :  { %1273 = vmatpush3.bf16.xpose.msk.msra.mxu0 %vm1438_vm1, %v1268_v15  ;;  %1314 = vmatpush3.bf16.xpose.msk.msra.mxu1 %vm1438_vm1, %v1268_v15  ;;  %v74_v5 = vld [vmem:[%s2390_s4 + $0x68] sm:$0xff]  ;;  %v67_v6 = vld [vmem:[%s2390_s4 + $0x30] sm:$0xff]  ;;  %v68_v8 = vld [vmem:[%s2390_s4 + $0x38] sm:$0xff] }
  0x16   :  { %1276 = vmatprep.subr.msk.bf16.mxu0 %vm1438_vm1, %v1274_v23  ;;  %1307 = vmatprep.subr.msk.bf16.mxu1 %vm1438_vm1, %v1274_v23  ;;  %v75_v7 = vld [vmem:[%s2390_s4 + $0x70] sm:$0xff]  ;;  %v76_v9 = vld [vmem:[%s2390_s4 + $0x78] sm:$0xff] }
  0x17   :  { %399 = vperm.xlu1 %1323, %v344_v24   ;;  %394 = vperm.xlu0 %1322, %v343_v25  }
  0x1b   :  { %409 = vperm.xlu1 %1323, %v346_v28   ;;  %404 = vperm.xlu0 %1322, %v345_v29  }
  0x1d   :  { %1279 = vmatpush3.bf16.xpose.msk.msra.mxu0 %vm1438_vm1, %v1274_v23  ;;  %1315 = vmatpush3.bf16.xpose.msk.msra.mxu1 %vm1438_vm1, %v1274_v23 }
  0x1e   :  { %1282 = vmatprep.subr.msk.bf16.mxu0 %vm1438_vm1, %v1280_v30  ;;  %1308 = vmatprep.subr.msk.bf16.mxu1 %vm1438_vm1, %v1280_v30 }
  0x1f   :  { %419 = vperm.xlu1 %1323, %v348_v31   ;;  %414 = vperm.xlu0 %1322, %v347_v32   ;;  %v572_v32 = vlaneseq }
  0x21   :  { %v1742_v34 = vand.u32 127, %v572_v32 }
  0x23   :  { %429 = vperm.xlu1 %1323, %v350_v35   ;;  %424 = vperm.xlu0 %1322, %v349_v36   ;;  %v1749_v36 = vld [vmem:[%s2392_s3] ss:$0 sm:$0xff]  ;;  %vm576_vm2 = vcmp.lt.s32.totalorder %v1742_v34, 8 }
  0x24   :  { %vm1764_vm6 = vmxor %vm576_vm2, %vm1389_vm5 }
  0x25   :  { %1285 = vmatpush3.bf16.xpose.msk.msra.mxu0 %vm1438_vm1, %v1280_v30  ;;  %1316 = vmatpush3.bf16.xpose.msk.msra.mxu1 %vm1438_vm1, %v1280_v30 }
  0x26   :  { %1288 = vmatprep.subr.msk.bf16.mxu0 %vm1438_vm1, %v1286_v37  ;;  %1309 = vmatprep.subr.msk.bf16.mxu1 %vm1438_vm1, %v1286_v37 }
  0x27   :  { %507 = vperm.xlu1 %1323, %v487_v38   ;;  %504 = vperm.xlu0 %1322, %v486_v39  }
  0x2b   :  { %513 = vperm.xlu1 %1323, %v489_v42   ;;  %510 = vperm.xlu0 %1322, %v488_v43  }
  0x2d   :  { %1291 = vmatpush3.bf16.xpose.msk.msra.mxu0 %vm1438_vm1, %v1286_v37  ;;  %1317 = vmatpush3.bf16.xpose.msk.msra.mxu1 %vm1438_vm1, %v1286_v37  ;;  %v1754_v37 = vld [vmem:[%s2393_s1] ss:$0 sm:$0xff] }
  0x2e   :  { %1294 = vmatprep.subr.msk.bf16.mxu0 %vm1438_vm1, %v1292_v44  ;;  %1310 = vmatprep.subr.msk.bf16.mxu1 %vm1438_vm1, %v1292_v44 }
  0x2f   :  { %519 = vperm.xlu1 %1323, %v491_v45   ;;  %516 = vperm.xlu0 %1322, %v490_v46  }
  0x33   :  { %525 = vperm.xlu1 %1323, %v493_v49   ;;  %522 = vperm.xlu0 %1322, %v492_v50  }
  0x35   :  { %1297 = vmatpush3.bf16.xpose.msk.msra.mxu0 %vm1438_vm1, %v1292_v44  ;;  %1318 = vmatpush3.bf16.xpose.msk.msra.mxu1 %vm1438_vm1, %v1292_v44 }
  0x36   :  { %1300 = vmatprep.subr.msk.bf16.mxu0 %vm1438_vm1, %v1298_v51  ;;  %1311 = vmatprep.subr.msk.bf16.mxu1 %vm1438_vm1, %v1298_v51 }
  0x37   :  { %531 = vperm.xlu1 %1323, %v495_v52   ;;  %528 = vperm.xlu0 %1322, %v494_v53  }
  0x3b   :  { %537 = vperm.xlu1 %1323, %v497_v54   ;;  %534 = vperm.xlu0 %1322, %v496_v55  }
  0x3d   :  { %1303 = vmatpush3.bf16.xpose.msk.msra.mxu0 %vm1438_vm1, %v1298_v51  ;;  %1319 = vmatpush3.bf16.xpose.msk.msra.mxu1 %vm1438_vm1, %v1298_v51 }
  0x3f   :  { %543 = vperm.xlu1 %1323, %v499_v56   ;;  %540 = vperm.xlu0 %1322, %v498_v57  }
  0x43   :  { %549 = vperm.xlu1 %1323, %v501_v58   ;;  %546 = vperm.xlu0 %1322, %v500_v63  }
  0x44   :  { %1233 = vmatmul.mubr.msk.f32.vlgmr.msra.gmra.mrb[0].mxu0 %vm93_vm0, %v62_v59  ;;  %1245 = vmatmul.mubr.msk.f32.vlgmr.msra.gmra.mrb[0].mxu1 %vm93_vm0, %v70_v60 }
  0x45   :  { %1235 = vmatprep.mubr.msk.f32.mxu0 %vm93_vm0, %v63_v61  ;;  %1247 = vmatprep.mubr.msk.f32.mxu1 %vm93_vm0, %v71_v62 }
  0x48   :  { %1236 = vmatmul.mubr.msk.f32.gmra.mrb[2].mxu0 %vm93_vm0, %v64_v0  ;;  %1248 = vmatmul.mubr.msk.f32.gmra.mrb[2].mxu1 %vm93_vm0, %v72_v1 }
  0x49   :  { %1238 = vmatprep.mubr.msk.f32.mxu0 %vm93_vm0, %v65_v2  ;;  %1250 = vmatprep.mubr.msk.f32.mxu1 %vm93_vm0, %v73_v3 }
  0x4c   :  { %1239 = vmatmul.mubr.msk.f32.gmra.mrb[4].mxu0 %vm93_vm0, %v66_v4  ;;  %1251 = vmatmul.mubr.msk.f32.gmra.mrb[4].mxu1 %vm93_vm0, %v74_v5 }
  0x4d   :  { %1241 = vmatprep.mubr.msk.f32.mxu0 %vm93_vm0, %v67_v6  ;;  %1253 = vmatprep.mubr.msk.f32.mxu1 %vm93_vm0, %v75_v7 }
  0x50   :  { %1242 = vmatmul.mubr.msk.f32.gmra.mrb[6].mxu0 %vm93_vm0, %v68_v8  ;;  %1254 = vmatmul.mubr.msk.f32.gmra.mrb[6].mxu1 %vm93_vm0, %v76_v9 }
  0x86   :  { %v365_v10 = vpop.permute.xlu1 %364  ;;  %v355_v11 = vpop.permute.xlu0 %354 }
  0x87   :  { %v438_v57 = vadd.f32 %v1749_v36, %v355_v11  ;;  %v440_v61 = vadd.f32 %v1749_v36, %v365_v10 }
  0x8a   :  { %v1708_v12 = vpop.permute.xlu1 %369  ;;  %v360_v13 = vpop.permute.xlu0 %359 }
  0x8b   :  { %v439_v39 = vadd.f32 %v1749_v36, %v360_v13 }
  0x8e   :  { %v1710_v14 = vpop.permute.xlu1 %379  ;;  %v1712_v15 = vpop.permute.xlu0 %374 }
  0x8f   :  { %v443_v10 = vadd.f32 %v1749_v36, %v1710_v14 }
  0x92   :  { %v1714_v16 = vpop.permute.xlu1 %389  ;;  %v1716_v17 = vpop.permute.xlu0 %384 }
  0x93   :  { %v445_v14 = vadd.f32 %v1749_v36, %v1714_v16 }
  0x96   :  { %v400_v18 = vpop.permute.xlu1 %399  ;;  %v395_v19 = vpop.permute.xlu0 %394 }
  0x97   :  { %v447_v42 = vadd.f32 %v1749_v36, %v400_v18  ;;  %v446_v47 = vadd.f32 %v1749_v36, %v395_v19  ;;  %v441_v19 = vadd.f32 %v1749_v36, %v1708_v12 }
  0x9a   :  { %v1718_v20 = vpop.permute.xlu1 %409  ;;  %v1720_v21 = vpop.permute.xlu0 %404 }
  0x9b   :  { %v448_v16 = vadd.f32 %v1749_v36, %v1720_v21 }
  0x9e   :  { %v1722_v22 = vpop.permute.xlu1 %419  ;;  %v1724_v23 = vpop.permute.xlu0 %414 }
  0x9f   :  { %v450_v12 = vadd.f32 %v1749_v36, %v1724_v23 }
  0xa2   :  { %v1726_v24 = vpop.permute.xlu1 %429  ;;  %v1728_v25 = vpop.permute.xlu0 %424 }
  0xa6   :  { %v508_v26 = vpop.permute.xlu1 %507  ;;  %v1730_v27 = vpop.permute.xlu0 %504 }
  0xa7   :  { %vm556_vm3 = vcmp.eq.s32.totalorder %v508_v26, %v1754_v37  ;;  %vm555_vm11 = vcmp.eq.s32.totalorder %v1730_v27, %v1754_v37 }
  0xa8   :  { %vm578_vm7 = vmand %vm556_vm3, %vm576_vm2 }
  0xa9   :  { %vm1787_vm10 = vmor %vm556_vm3, %vm1764_vm6 }
  0xaa   :  { %v1732_v28 = vpop.permute.xlu1 %513  ;;  %v1734_v29 = vpop.permute.xlu0 %510  ;;  %vm1822_vm13 = vmor %vm555_vm11, %vm1764_vm6 }
  0xab   :  { %vm558_vm15 = vcmp.eq.s32.totalorder %v1732_v28, %v1754_v37  ;;  %vm1867_vm3 = vmand %vm555_vm11, %vm576_vm2 }
  0xac   :  { %vm580_vm5 = vmand %vm558_vm15, %vm576_vm2 }
  0xae   :  { %v1736_v30 = vpop.permute.xlu1 %519  ;;  %v1738_v31 = vpop.permute.xlu0 %516 }
  0xaf   :  { %vm559_vm11 = vcmp.eq.s32.totalorder %v1738_v31, %v1754_v37 }
  0xb2   :  { %v1740_v33 = vpop.permute.xlu1 %525  ;;  %v1744_v35 = vpop.permute.xlu0 %522 }
  0xb6   :  { %v532_v38 = vpop.permute.xlu1 %531  ;;  %v529_v50 = vpop.permute.xlu0 %528 }
  0xb7   :  { %vm564_vm4 = vcmp.eq.s32.totalorder %v532_v38, %v1754_v37  ;;  %vm563_vm8 = vcmp.eq.s32.totalorder %v529_v50, %v1754_v37 }
  0xb8   :  { %vm586_vm9 = vmand %vm564_vm4, %vm576_vm2 }
  0xb9   :  { %vm1798_vm12 = vmand %vm563_vm8, %vm576_vm2 }
  0xba   :  { %vm1832_vm14 = vmor %vm564_vm4, %vm1764_vm6 }
  0xbb   :  { %vm1857_vm0 = vmor %vm563_vm8, %vm1764_vm6 }
 0x117   :  { %v1234_v40 = vpop.f32.mrb[0].mxu0  ;;  %v1246_v41 = vpop.f32.mrb[0].mxu1 }
 0x118   :  { %v455_v43 = vmul.f32 2.0, %v1234_v40  ;;  %v463_v44 = vmul.f32 2.0, %v1246_v41  ;;  %v256_v45 = vpop.f32.mrb[1].mxu0  ;;  %v296_v46 = vpop.f32.mrb[1].mxu1 }
 0x119   :  { %v462_v48 = vmul.f32 2.0, %v296_v46  ;;  %v454_v53 = vmul.f32 2.0, %v256_v45  ;;  %v535_v40 = vpop.permute.xlu0 %534 }
 0x11a   :  { %v471_v51 = vsub.f32 %v439_v39, %v455_v43  ;;  %v1768_v52 = vsub.f32 %v447_v42, %v463_v44  ;;  %v444_v44 = vadd.f32 %v1749_v36, %v1716_v17  ;;  %vm565_vm1 = vcmp.eq.s32.totalorder %v535_v40, %v1754_v37 }
 0x11b   :  { %v1775_v54 = vsub.f32 %v446_v47, %v462_v48  ;;  %v1237_v55 = vpop.f32.mrb[2].mxu0  ;;  %v1249_v56 = vpop.f32.mrb[2].mxu1  ;;  %v470_v3 = vsub.f32 %v438_v57, %v454_v53  ;;  %v453_v48 = vadd.f32 %v1749_v36, %v1726_v24  ;;  %vm587_vm4 = vmand %vm565_vm1, %vm576_vm2 }
 0x11c   :  { %v266_v58 = vpop.f32.mrb[3].mxu0  ;;  %v306_v59 = vpop.f32.mrb[3].mxu1  ;;  %v594_v60 = vsel %vm578_vm7, %v471_v51, -1e+30  ;;  %v602_v1 = vsel %vm586_vm9, %v1768_v52, -1e+30  ;;  %vm557_vm7 = vcmp.eq.s32.totalorder %v1734_v29, %v1754_v37 }
 0x11d   :  { %v456_v63 = vmul.f32 2.0, %v266_v58  ;;  %v675_v0 = vmax.f32 %v594_v60, -1e+30  ;;  %v683_v4 = vmax.f32 %v602_v1, -1e+30  ;;  %v464_v32 = vmul.f32 2.0, %v306_v59  ;;  %vm612_vm9 = vmor %vm557_vm7, %vm1764_vm6  ;;  %v541_v40 = vpop.permute.xlu0 %540 }
 0x11e   :  { %v627_v8 = vsel %vm1787_vm10, 1e+30, %v471_v51  ;;  %v601_v9 = vsel %vm1798_vm12, %v1775_v54, -1e+30  ;;  %v626_v43 = vsel %vm1822_vm13, 1e+30, %v470_v3  ;;  %v449_v1 = vadd.f32 %v1749_v36, %v1718_v20  ;;  %vm620_vm12 = vmor %vm565_vm1, %vm1764_vm6 }
 0x11f   :  { %v1802_v5 = vsub.f32 %v440_v61, %v456_v63  ;;  %v1240_v6 = vpop.f32.mrb[4].mxu0  ;;  %v1804_v7 = vpop.f32.mrb[4].mxu1  ;;  %759 = vmax.xlane.f32.xlu1 %v675_v0  ;;  %775 = vmax.xlane.f32.xlu0 %v683_v4  ;;  %v682_v39 = vmax.f32 %v601_v9, -1e+30  ;;  %v691_v42 = vmin.f32 %v627_v8, 1e+30  ;;  %v480_v24 = vsub.f32 %v448_v16, %v464_v32  ;;  %vm613_vm13 = vmor %vm558_vm15, %vm1764_vm6 }
 0x120   :  { %v459_v11 = vmul.f32 2.0, %v1240_v6  ;;  %v276_v13 = vpop.f32.mrb[5].mxu0  ;;  %v1813_v18 = vpop.f32.mrb[5].mxu1  ;;  %v457_v45 = vmul.f32 2.0, %v1237_v55  ;;  %v635_v47 = vsel %vm1832_vm14, 1e+30, %v1768_v52  ;;  %vm581_vm14 = vmand %vm559_vm11, %vm576_vm2 }
 0x121   :  { %v690_v55 = vmin.f32 %v626_v43, 1e+30  ;;  %v699_v60 = vmin.f32 %v635_v47, 1e+30  ;;  %v634_v61 = vsel %vm1857_vm0, 1e+30, %v1775_v54  ;;  %v538_v54 = vpop.permute.xlu1 %537  ;;  %vm567_vm0 = vcmp.eq.s32.totalorder %v541_v40, %v1754_v37 }
 0x122   :  { %v1836_v41 = vsub.f32 %v443_v10, %v459_v11  ;;  %v473_v62 = vsub.f32 %v441_v19, %v457_v45  ;;  %v465_v63 = vmul.f32 2.0, %v1249_v56  ;;  %v593_v27 = vsel %vm1867_vm3, %v470_v3, -1e+30  ;;  %vm589_vm1 = vmand %vm567_vm0, %vm576_vm2 }
 0x123   :  { %v1243_v46 = vpop.f32.mrb[6].mxu0  ;;  %v1255_v38 = vpop.f32.mrb[6].mxu1  ;;  %773 = vmax.xlane.f32.xlu1 %v682_v39  ;;  %952 = vmin.xlane.f32.xlu0 %v691_v42  ;;  %v698_v2 = vmin.f32 %v634_v61, 1e+30  ;;  %v674_v56 = vmax.f32 %v593_v27, -1e+30  ;;  %vm566_vm8 = vcmp.eq.s32.totalorder %v538_v54, %v1754_v37  ;;  %v442_v19 = vadd.f32 %v1749_v36, %v1712_v15  ;;  %vm579_vm3 = vmand %vm557_vm7, %vm576_vm2 }
 0x124   :  { %v461_v51 = vmul.f32 2.0, %v1243_v46  ;;  %v469_v53 = vmul.f32 2.0, %v1255_v38  ;;  %v286_v17 = vpop.f32.mrb[7].mxu0  ;;  %v1851_v57 = vpop.f32.mrb[7].mxu1  ;;  %v603_v3 = vsel %vm587_vm4, %v480_v24, -1e+30  ;;  %v481_v20 = vsub.f32 %v449_v1, %v465_v63  ;;  %vm588_vm10 = vmand %vm566_vm8, %vm576_vm2 }
 0x125   :  { %v460_v52 = vmul.f32 2.0, %v286_v17  ;;  %v596_v4 = vsel %vm580_vm5, %v473_v62, -1e+30  ;;  %v684_v6 = vmax.f32 %v603_v3, -1e+30  ;;  %v458_v8 = vmul.f32 2.0, %v276_v13  ;;  %vm621_vm15 = vmor %vm566_vm8, %vm1764_vm6 }
 0x126   :  { %v1871_v59 = vsub.f32 %v445_v14, %v461_v51  ;;  %v1873_v50 = vsub.f32 %v453_v48, %v469_v53  ;;  %v677_v9 = vmax.f32 %v596_v4, -1e+30  ;;  %v628_v10 = vsel %vm612_vm9, 1e+30, %v1802_v5  ;;  %vm614_vm5 = vmor %vm559_vm11, %vm1764_vm6 }
 0x127   :  { %v1878_v0 = vsub.f32 %v444_v44, %v460_v52  ;;  %950 = vmin.xlane.f32.xlu1 %v690_v55  ;;  %968 = vmin.xlane.f32.xlu0 %v699_v60  ;;  %v604_v11 = vsel %vm588_vm10, %v481_v20, -1e+30  ;;  %v692_v26 = vmin.f32 %v628_v10, 1e+30  ;;  %v474_v13 = vsub.f32 %v442_v19, %v458_v8  ;;  %vm622_vm9 = vmor %vm567_vm0, %vm1764_vm6 }
 0x128   :  { %v466_v32 = vmul.f32 2.0, %v1813_v18  ;;  %v685_v15 = vmax.f32 %v604_v11, -1e+30  ;;  %v636_v39 = vsel %vm620_vm12, 1e+30, %v480_v24  ;;  %vm560_vm4 = vcmp.eq.s32.totalorder %v1736_v30, %v1754_v37  ;;  %v547_v24 = vpop.permute.xlu0 %546 }
 0x129   :  { %v629_v14 = vsel %vm613_vm13, 1e+30, %v473_v62  ;;  %v700_v28 = vmin.f32 %v636_v39, 1e+30  ;;  %v597_v43 = vsel %vm581_vm14, %v474_v13, -1e+30  ;;  %v451_v47 = vadd.f32 %v1749_v36, %v1722_v22  ;;  %vm582_vm7 = vmand %vm560_vm4, %vm576_vm2 }
 0x12a   :  { %v482_v18 = vsub.f32 %v450_v12, %v466_v32  ;;  %v693_v42 = vmin.f32 %v629_v14, 1e+30  ;;  %v637_v23 = vsel %vm621_vm15, 1e+30, %v481_v20  ;;  %v678_v44 = vmax.f32 %v597_v43, -1e+30  ;;  %vm615_vm13 = vmor %vm560_vm4, %vm1764_vm6 }
 0x12b   :  { %966 = vmin.xlane.f32.xlu1 %v698_v2  ;;  %757 = vmax.xlane.f32.xlu0 %v674_v56  ;;  %v701_v16 = vmin.f32 %v637_v23, 1e+30  ;;  %v467_v46 = vmul.f32 2.0, %v1804_v7  ;;  %v595_v38 = vsel %vm579_vm3, %v1802_v5, -1e+30  ;;  %v544_v7 = vpop.permute.xlu1 %543  ;;  %vm561_vm11 = vcmp.eq.s32.totalorder %v1744_v35, %v1754_v37 }
 0x12c   :  { %v605_v45 = vsel %vm589_vm1, %v482_v18, -1e+30  ;;  %v676_v48 = vmax.f32 %v595_v38, -1e+30  ;;  %v630_v5 = vsel %vm614_vm5, 1e+30, %v474_v13  ;;  %vm568_vm8 = vcmp.eq.s32.totalorder %v544_v7, %v1754_v37  ;;  %vm583_vm12 = vmand %vm561_vm11, %vm576_vm2 }
 0x12d   :  { %v686_v29 = vmax.f32 %v605_v45, -1e+30  ;;  %v483_v51 = vsub.f32 %v451_v47, %v467_v46  ;;  %v598_v22 = vsel %vm582_vm7, %v1836_v41, -1e+30  ;;  %v694_v31 = vmin.f32 %v630_v5, 1e+30  ;;  %vm590_vm10 = vmand %vm568_vm8, %vm576_vm2 }
 0x12e   :  { %v468_v53 = vmul.f32 2.0, %v1851_v57  ;;  %v679_v17 = vmax.f32 %v598_v22, -1e+30  ;;  %v638_v21 = vsel %vm622_vm9, 1e+30, %v482_v18  ;;  %v452_v55 = vadd.f32 %v1749_v36, %v1728_v25  ;;  %vm623_vm0 = vmor %vm568_vm8, %vm1764_vm6 }
 0x12f   :  { %777 = vmax.xlane.f32.xlu1 %v684_v6  ;;  %763 = vmax.xlane.f32.xlu0 %v677_v9  ;;  %v606_v52 = vsel %vm590_vm10, %v483_v51, -1e+30  ;;  %v702_v58 = vmin.f32 %v638_v21, 1e+30  ;;  %vm569_vm14 = vcmp.eq.s32.totalorder %v547_v24, %v1754_v37  ;;  %v599_v25 = vsel %vm583_vm12, %v1878_v0, -1e+30  ;;  %vm616_vm3 = vmor %vm561_vm11, %vm1764_vm6 }
 0x130   :  { %v484_v57 = vsub.f32 %v452_v55, %v468_v53  ;;  %v687_v60 = vmax.f32 %v606_v52, -1e+30  ;;  %v631_v36 = vsel %vm615_vm13, 1e+30, %v1836_v41  ;;  %vm591_vm15 = vmand %vm569_vm14, %vm576_vm2  ;;  %v680_v61 = vmax.f32 %v599_v25, -1e+30  ;;  %v550_v41 = vpop.permute.xlu1 %549 }
 0x131   :  { %v695_v30 = vmin.f32 %v631_v36, 1e+30  ;;  %vm562_vm1 = vcmp.eq.s32.totalorder %v1740_v33, %v1754_v37  ;;  %v639_v63 = vsel %vm623_vm0, 1e+30, %v483_v51  ;;  %v632_v2 = vsel %vm616_vm3, 1e+30, %v1878_v0  ;;  %vm624_vm7 = vmor %vm569_vm14, %vm1764_vm6 }
 0x132   :  { %v607_v62 = vsel %vm591_vm15, %v484_v57, -1e+30  ;;  %vm584_vm4 = vmand %vm562_vm1, %vm576_vm2  ;;  %v703_v1 = vmin.f32 %v639_v63, 1e+30  ;;  %vm570_vm5 = vcmp.eq.s32.totalorder %v550_v41, %v1754_v37  ;;  %v696_v35 = vmin.f32 %v632_v2, 1e+30 }
 0x133   :  { %954 = vmin.xlane.f32.xlu1 %v692_v26  ;;  %779 = vmax.xlane.f32.xlu0 %v685_v15  ;;  %v688_v27 = vmax.f32 %v607_v62, -1e+30  ;;  %v600_v54 = vsel %vm584_vm4, %v1871_v59, -1e+30  ;;  %vm592_vm8 = vmand %vm570_vm5, %vm576_vm2  ;;  %v640_v3 = vsel %vm624_vm7, 1e+30, %v484_v57 }
 0x134   :  { %v681_v56 = vmax.f32 %v600_v54, -1e+30  ;;  %v608_v0 = vsel %vm592_vm8, %v1873_v50, -1e+30  ;;  %v704_v20 = vmin.f32 %v640_v3, 1e+30  ;;  %vm617_vm9 = vmor %vm562_vm1, %vm1764_vm6 }
 0x135   :  { %v689_v4 = vmax.f32 %v608_v0, -1e+30  ;;  %v633_v34 = vsel %vm617_vm9, 1e+30, %v1871_v59  ;;  %vm625_vm2 = vmor %vm570_vm5, %vm1764_vm6  ;;  %vm917_vm6 = vcmask 7168  }
 0x136   :  { %v697_v6 = vmin.f32 %v633_v34, 1e+30  ;;  %v641_v8 = vsel %vm625_vm2, 1e+30, %v1873_v50 }
 0x137   :  { %970 = vmin.xlane.f32.xlu1 %v700_v28  ;;  %956 = vmin.xlane.f32.xlu0 %v693_v42  ;;  %v705_v9 = vmin.f32 %v641_v8, 1e+30 }
 0x13b   :  { %765 = vmax.xlane.f32.xlu1 %v678_v44  ;;  %972 = vmin.xlane.f32.xlu0 %v701_v16 }
 0x13f   :  { %781 = vmax.xlane.f32.xlu1 %v686_v29  ;;  %761 = vmax.xlane.f32.xlu0 %v676_v48 }
 0x143   :  { %958 = vmin.xlane.f32.xlu1 %v694_v31  ;;  %767 = vmax.xlane.f32.xlu0 %v679_v17 }
 0x147   :  { %974 = vmin.xlane.f32.xlu1 %v702_v58  ;;  %783 = vmax.xlane.f32.xlu0 %v687_v60 }
 0x14b   :  { %769 = vmax.xlane.f32.xlu1 %v680_v61  ;;  %960 = vmin.xlane.f32.xlu0 %v695_v30 }
 0x14f   :  { %785 = vmax.xlane.f32.xlu1 %v688_v27  ;;  %976 = vmin.xlane.f32.xlu0 %v703_v1 }
 0x153   :  { %962 = vmin.xlane.f32.xlu1 %v696_v35  ;;  %771 = vmax.xlane.f32.xlu0 %v681_v56 }
 0x157   :  { %978 = vmin.xlane.f32.xlu1 %v704_v20  ;;  %787 = vmax.xlane.f32.xlu0 %v689_v4 }
 0x15b   :  { %964 = vmin.xlane.f32.xlu0 %v697_v6 }
 0x15f   :  { %980 = vmin.xlane.f32.xlu0 %v705_v9 }
 0x1ac   :  { %v760_v10 = vpop.xlane.xlu1 %759  ;;  %v776_v33 = vpop.xlane.xlu0 %775 }
 0x1ad   :  { %v790_v11 = vmax.f32 %v760_v10, 1e-12  ;;  %v798_v19 = vmax.f32 %v776_v33, 1e-12 }
 0x1af   :  { %1324 = vrsqrt.f32 %v790_v11  ;;  %vm814_vm10 = vcmp.eq.f32.partialorder %v790_v11, inf  ;;  %vm816_vm11 = vcmp.eq.f32.partialorder %v790_v11, 0.0  ;;  %v817_v43 = vand.u32 2147483648, %v790_v11 }
 0x1b0   :  { %1326 = vrsqrt.f32 %v798_v19  ;;  %v774_v26 = vpop.xlane.xlu1 %773  ;;  %v953_v13 = vpop.xlane.xlu0 %952  ;;  %vm870_vm12 = vcmp.eq.f32.partialorder %v798_v19, inf  ;;  %v873_v16 = vand.u32 2147483648, %v798_v19  ;;  %vm872_vm13 = vcmp.eq.f32.partialorder %v798_v19, 0.0 }
 0x1b1   :  { %v797_v59 = vmax.f32 %v774_v26, 1e-12  ;;  %v983_v32 = vmax.f32 %v953_v13, 1e-12 }
 0x1b3   :  { %1328 = vrsqrt.f32 %v797_v59  ;;  %vm863_vm14 = vcmp.eq.f32.partialorder %v797_v59, inf  ;;  %vm865_vm15 = vcmp.eq.f32.partialorder %v797_v59, 0.0  ;;  %v866_v31 = vand.u32 2147483648, %v797_v59 }
 0x1b4   :  { %1330 = vrsqrt.f32 %v983_v32  ;;  %v951_v37 = vpop.xlane.xlu1 %950  ;;  %v969_v15 = vpop.xlane.xlu0 %968  ;;  %vm1007_vm0 = vcmp.eq.f32.partialorder %v983_v32, inf  ;;  %v1010_v21 = vand.u32 2147483648, %v983_v32  ;;  %vm1009_vm1 = vcmp.eq.f32.partialorder %v983_v32, 0.0 }
 0x1b5   :  { %v2028_v49 = vmax.f32 %v951_v37, 1e-12  ;;  %v2030_v50 = vmax.f32 %v969_v15, 1e-12 }
 0x1b7   :  { %1332 = vrsqrt.f32 %v2028_v49  ;;  %vm1000_vm3 = vcmp.eq.f32.partialorder %v2028_v49, inf  ;;  %v1003_v61 = vand.u32 2147483648, %v2028_v49  ;;  %vm1002_vm4 = vcmp.eq.f32.partialorder %v2028_v49, 0.0 }
 0x1b8   :  { %1334 = vrsqrt.f32 %v2030_v50  ;;  %v967_v39 = vpop.xlane.xlu1 %966  ;;  %v758_v40 = vpop.xlane.xlu0 %757  ;;  %vm1063_vm5 = vcmp.eq.f32.partialorder %v2030_v50, inf  ;;  %v1066_v27 = vand.u32 2147483648, %v2030_v50  ;;  %vm1065_vm7 = vcmp.eq.f32.partialorder %v2030_v50, 0.0 }
 0x1b9   :  { %v1325_v14 = vpop.eup %1324  ;;  %v2034_v12 = vmax.f32 %v967_v39, 1e-12  ;;  %v2036_v42 = vmax.f32 %v758_v40, 1e-12 }
 0x1ba   :  { %v1327_v28 = vpop.eup %1326  ;;  %v813_v18 = vmul.f32 %v1325_v14, %v790_v11 }
 0x1bb   :  { %v869_v23 = vmul.f32 %v1327_v28, %v798_v19  ;;  %1336 = vrsqrt.f32 %v2034_v12  ;;  %vm1056_vm8 = vcmp.eq.f32.partialorder %v2034_v12, inf  ;;  %vm1058_vm9 = vcmp.eq.f32.partialorder %v2034_v12, 0.0 }
 0x1bc   :  { %v815_v44 = vsel %vm814_vm10, %v790_v11, %v813_v18  ;;  %1338 = vrsqrt.f32 %v2036_v42  ;;  %v778_v45 = vpop.xlane.xlu1 %777  ;;  %v764_v29 = vpop.xlane.xlu0 %763  ;;  %v1059_v4 = vand.u32 2147483648, %v2034_v12  ;;  %vm807_vm2 = vcmp.eq.f32.partialorder %v2036_v42, inf }
 0x1bd   :  { %v1329_v46 = vpop.eup %1328  ;;  %v818_v38 = vsel %vm816_vm11, %v817_v43, %v815_v44  ;;  %v871_v47 = vsel %vm870_vm12, %v798_v19, %v869_v23  ;;  %v2044_v51 = vmax.f32 %v778_v45, 1e-12  ;;  %v2046_v22 = vmax.f32 %v764_v29, 1e-12 }
 0x1be   :  { %v1331_v7 = vpop.eup %1330  ;;  %919 = vst.msk [vmem:[%s2394_s6 + $0x8] sm:$0xff] %vm917_vm6, %v818_v38  ;;  %v874_v48 = vsel %vm872_vm13, %v873_v16, %v871_v47  ;;  %v862_v5 = vmul.f32 %v1329_v46, %v797_v59  ;;  %v810_v8 = vand.u32 2147483648, %v2036_v42  ;;  %vm809_vm10 = vcmp.eq.f32.partialorder %v2036_v42, 0.0 }
 0x1bf   :  { %927 = vst.msk [vmem:[%s2394_s6 + $0x48] sm:$0xff] %vm917_vm6, %v874_v48  ;;  %v1006_v53 = vmul.f32 %v1331_v7, %v983_v32  ;;  %1340 = vrsqrt.f32 %v2044_v51  ;;  %vm877_vm11 = vcmp.eq.f32.partialorder %v2044_v51, inf  ;;  %vm879_vm12 = vcmp.eq.f32.partialorder %v2044_v51, 0.0 }
 0x1c0   :  { %v864_v17 = vsel %vm863_vm14, %v797_v59, %v862_v5  ;;  %v955_v24 = vpop.xlane.xlu1 %954  ;;  %1342 = vrsqrt.f32 %v2046_v22  ;;  %v780_v57 = vpop.xlane.xlu0 %779  ;;  %v880_v15 = vand.u32 2147483648, %v2044_v51  ;;  %vm828_vm13 = vcmp.eq.f32.partialorder %v2046_v22, inf }
 0x1c1   :  { %v1333_v52 = vpop.eup %1332  ;;  %v867_v55 = vsel %vm865_vm15, %v866_v31, %v864_v17  ;;  %v1008_v58 = vsel %vm1007_vm0, %v983_v32, %v1006_v53  ;;  %v2066_v62 = vmax.f32 %v955_v24, 1e-12  ;;  %v2068_v63 = vmax.f32 %v780_v57, 1e-12 }
 0x1c2   :  { %v1335_v60 = vpop.eup %1334  ;;  %926 = vst.msk [vmem:[%s2394_s6 + $0x40] sm:$0xff] %vm917_vm6, %v867_v55  ;;  %v1011_v25 = vsel %vm1009_vm1, %v1010_v21, %v1008_v58  ;;  %v999_v36 = vmul.f32 %v1333_v52, %v2028_v49  ;;  %vm830_vm14 = vcmp.eq.f32.partialorder %v2046_v22, 0.0 }
 0x1c3   :  { %1111 = vst.msk [vmem:[%s2395_s7 + $0x8] sm:$0xff] %vm917_vm6, %v1011_v25  ;;  %v1062_v30 = vmul.f32 %v1335_v60, %v2030_v50  ;;  %1344 = vrsqrt.f32 %v2066_v62  ;;  %vm1014_vm15 = vcmp.eq.f32.partialorder %v2066_v62, inf  ;;  %vm1016_vm0 = vcmp.eq.f32.partialorder %v2066_v62, 0.0 }
 0x1c4   :  { %v1001_v41 = vsel %vm1000_vm3, %v2028_v49, %v999_v36  ;;  %v971_v1 = vpop.xlane.xlu1 %970  ;;  %v957_v56 = vpop.xlane.xlu0 %956  ;;  %1346 = vrsqrt.f32 %v2068_v63  ;;  %v1017_v47 = vand.u32 2147483648, %v2066_v62  ;;  %vm884_vm1 = vcmp.eq.f32.partialorder %v2068_v63, inf }
 0x1c5   :  { %v1337_v2 = vpop.eup %1336  ;;  %v1004_v54 = vsel %vm1002_vm4, %v1003_v61, %v1001_v41  ;;  %v1064_v35 = vsel %vm1063_vm5, %v2030_v50, %v1062_v30  ;;  %v2094_v9 = vmax.f32 %v971_v1, 1e-12  ;;  %v2096_v10 = vmax.f32 %v957_v56, 1e-12 }
 0x1c6   :  { %v1339_v3 = vpop.eup %1338  ;;  %1110 = vst.msk [vmem:[%s2395_s7] sm:$0xff] %vm917_vm6, %v1004_v54  ;;  %v1067_v0 = vsel %vm1065_vm7, %v1066_v27, %v1064_v35  ;;  %v1055_v20 = vmul.f32 %v1337_v2, %v2034_v12  ;;  %vm886_vm3 = vcmp.eq.f32.partialorder %v2068_v63, 0.0 }
 0x1c7   :  { %1119 = vst.msk [vmem:[%s2395_s7 + $0x48] sm:$0xff] %vm917_vm6, %v1067_v0  ;;  %v806_v34 = vmul.f32 %v1339_v3, %v2036_v42  ;;  %1348 = vrsqrt.f32 %v2094_v9  ;;  %vm1070_vm4 = vcmp.eq.f32.partialorder %v2094_v9, inf  ;;  %vm1072_vm5 = vcmp.eq.f32.partialorder %v2094_v9, 0.0 }
 0x1c8   :  { %v1057_v6 = vsel %vm1056_vm8, %v2034_v12, %v1055_v20  ;;  %v766_v11 = vpop.xlane.xlu1 %765  ;;  %v973_v59 = vpop.xlane.xlu0 %972  ;;  %1350 = vrsqrt.f32 %v2096_v10  ;;  %v831_v12 = vand.u32 2147483648, %v2046_v22  ;;  %v1073_v58 = vand.u32 2147483648, %v2094_v9 }
 0x1c9   :  { %v1060_v33 = vsel %vm1058_vm9, %v1059_v4, %v1057_v6  ;;  %v808_v19 = vsel %vm807_vm2, %v2036_v42, %v806_v34  ;;  %v2100_v26 = vmax.f32 %v766_v11, 1e-12  ;;  %v1341_v13 = vpop.eup %1340  ;;  %v2123_v42 = vmax.f32 %v973_v59, 1e-12 }
 0x1ca   :  { %1118 = vst.msk [vmem:[%s2395_s7 + $0x40] sm:$0xff] %vm917_vm6, %v1060_v33  ;;  %v811_v32 = vsel %vm809_vm10, %v810_v8, %v808_v19  ;;  %v1343_v37 = vpop.eup %1342  ;;  %v876_v49 = vmul.f32 %v1341_v13, %v2044_v51  ;;  %vm1021_vm7 = vcmp.eq.f32.partialorder %v2096_v10, inf  ;;  %vm1023_vm8 = vcmp.eq.f32.partialorder %v2096_v10, 0.0 }
 0x1cb   :  { %918 = vst.msk [vmem:[%s2394_s6] sm:$0xff] %vm917_vm6, %v811_v32  ;;  %v827_v50 = vmul.f32 %v1343_v37, %v2046_v22  ;;  %1352 = vrsqrt.f32 %v2100_v26  ;;  %v1024_v30 = vand.u32 2147483648, %v2096_v10  ;;  %vm835_vm9 = vcmp.eq.f32.partialorder %v2100_v26, inf }
 0x1cc   :  { %v782_v39 = vpop.xlane.xlu1 %781  ;;  %v878_v14 = vsel %vm877_vm11, %v2044_v51, %v876_v49  ;;  %v762_v40 = vpop.xlane.xlu0 %761  ;;  %1354 = vrsqrt.f32 %v2123_v42  ;;  %v887_v51 = vand.u32 2147483648, %v2068_v63  ;;  %v838_v27 = vand.u32 2147483648, %v2100_v26 }
 0x1cd   :  { %v881_v28 = vsel %vm879_vm12, %v880_v15, %v878_v14  ;;  %v829_v18 = vsel %vm828_vm13, %v2046_v22, %v827_v50  ;;  %v2125_v43 = vmax.f32 %v782_v39, 1e-12  ;;  %v1345_v23 = vpop.eup %1344  ;;  %v2131_v16 = vmax.f32 %v762_v40, 1e-12 }
 0x1ce   :  { %928 = vst.msk [vmem:[%s2394_s6 + $0x50] sm:$0xff] %vm917_vm6, %v881_v28  ;;  %v832_v44 = vsel %vm830_vm14, %v831_v12, %v829_v18  ;;  %v1013_v45 = vmul.f32 %v1345_v23, %v2066_v62  ;;  %v1347_v38 = vpop.eup %1346  ;;  %vm837_vm2 = vcmp.eq.f32.partialorder %v2100_v26, 0.0  ;;  %vm1077_vm10 = vcmp.eq.f32.partialorder %v2123_v42, inf }
 0x1cf   :  { %921 = vst.msk [vmem:[%s2394_s6 + $0x18] sm:$0xff] %vm917_vm6, %v832_v44  ;;  %1356 = vrsqrt.f32 %v2125_v43  ;;  %v883_v48 = vmul.f32 %v1347_v38, %v2068_v63  ;;  %vm1079_vm11 = vcmp.eq.f32.partialorder %v2123_v42, 0.0  ;;  %v1080_v4 = vand.u32 2147483648, %v2123_v42 }
 0x1d0   :  { %v959_v46 = vpop.xlane.xlu1 %958  ;;  %v768_v29 = vpop.xlane.xlu0 %767  ;;  %v1015_v7 = vsel %vm1014_vm15, %v2066_v62, %v1013_v45  ;;  %1358 = vrsqrt.f32 %v2131_v16  ;;  %vm891_vm12 = vcmp.eq.f32.partialorder %v2125_v43, inf  ;;  %vm893_vm13 = vcmp.eq.f32.partialorder %v2125_v43, 0.0 }
 0x1d1   :  { %v1018_v5 = vsel %vm1016_vm0, %v1017_v47, %v1015_v7  ;;  %v1349_v22 = vpop.eup %1348  ;;  %v885_v31 = vsel %vm884_vm1, %v2068_v63, %v883_v48  ;;  %v2156_v53 = vmax.f32 %v959_v46, 1e-12  ;;  %v2158_v17 = vmax.f32 %v768_v29, 1e-12 }
 0x1d2   :  { %1112 = vst.msk [vmem:[%s2395_s7 + $0x10] sm:$0xff] %vm917_vm6, %v1018_v5  ;;  %v1351_v24 = vpop.eup %1350  ;;  %v888_v52 = vsel %vm886_vm3, %v887_v51, %v885_v31  ;;  %v1069_v55 = vmul.f32 %v1349_v22, %v2094_v9  ;;  %v894_v19 = vand.u32 2147483648, %v2125_v43  ;;  %vm821_vm14 = vcmp.eq.f32.partialorder %v2131_v16, inf }
 0x1d3   :  { %929 = vst.msk [vmem:[%s2394_s6 + $0x58] sm:$0xff] %vm917_vm6, %v888_v52  ;;  %v1020_v36 = vmul.f32 %v1351_v24, %v2096_v10  ;;  %1360 = vrsqrt.f32 %v2156_v53  ;;  %v824_v37 = vand.u32 2147483648, %v2131_v16  ;;  %vm823_vm15 = vcmp.eq.f32.partialorder %v2131_v16, 0.0 }
 0x1d4   :  { %v975_v21 = vpop.xlane.xlu1 %974  ;;  %v784_v60 = vpop.xlane.xlu0 %783  ;;  %v1071_v61 = vsel %vm1070_vm4, %v2094_v9, %v1069_v55  ;;  %1362 = vrsqrt.f32 %v2158_v17  ;;  %vm1028_vm0 = vcmp.eq.f32.partialorder %v2156_v53, inf  ;;  %vm1030_vm1 = vcmp.eq.f32.partialorder %v2156_v53, 0.0 }
 0x1d5   :  { %v2162_v57 = vmax.f32 %v975_v21, 1e-12  ;;  %v1353_v25 = vpop.eup %1352  ;;  %v1074_v63 = vsel %vm1072_vm5, %v1073_v58, %v1071_v61  ;;  %v1022_v41 = vsel %vm1021_vm7, %v2096_v10, %v1020_v36  ;;  %v2202_v34 = vmax.f32 %v784_v60, 1e-12 }
 0x1d6   :  { %v834_v62 = vmul.f32 %v1353_v25, %v2100_v26  ;;  %1120 = vst.msk [vmem:[%s2395_s7 + $0x50] sm:$0xff] %vm917_vm6, %v1074_v63  ;;  %v1025_v2 = vsel %vm1023_vm8, %v1024_v30, %v1022_v41  ;;  %v1355_v56 = vpop.eup %1354  ;;  %v1031_v28 = vand.u32 2147483648, %v2156_v53  ;;  %vm842_vm3 = vcmp.eq.f32.partialorder %v2158_v17, inf }
 0x1d7   :  { %1364 = vrsqrt.f32 %v2162_v57  ;;  %1113 = vst.msk [vmem:[%s2395_s7 + $0x18] sm:$0xff] %vm917_vm6, %v1025_v2  ;;  %v1076_v20 = vmul.f32 %v1355_v56, %v2123_v42  ;;  %vm844_vm4 = vcmp.eq.f32.partialorder %v2158_v17, 0.0  ;;  %v845_v45 = vand.u32 2147483648, %v2158_v17 }
 0x1d8   :  { %v770_v1 = vpop.xlane.xlu1 %769  ;;  %v836_v54 = vsel %vm835_vm9, %v2100_v26, %v834_v62  ;;  %v961_v35 = vpop.xlane.xlu0 %960  ;;  %1366 = vrsqrt.f32 %v2202_v34  ;;  %vm1084_vm5 = vcmp.eq.f32.partialorder %v2162_v57, inf  ;;  %v1087_v5 = vand.u32 2147483648, %v2162_v57 }
 0x1d9   :  { %v839_v3 = vsel %vm837_vm2, %v838_v27, %v836_v54  ;;  %v1357_v0 = vpop.eup %1356  ;;  %v2204_v6 = vmax.f32 %v770_v1, 1e-12  ;;  %v2209_v10 = vmax.f32 %v961_v35, 1e-12  ;;  %v1078_v33 = vsel %vm1077_vm10, %v2123_v42, %v1076_v20 }
 0x1da   :  { %922 = vst.msk [vmem:[%s2394_s6 + $0x20] sm:$0xff] %vm917_vm6, %v839_v3  ;;  %v1359_v8 = vpop.eup %1358  ;;  %v890_v9 = vmul.f32 %v1357_v0, %v2125_v43  ;;  %v1081_v13 = vsel %vm1079_vm11, %v1080_v4, %v1078_v33  ;;  %vm1086_vm7 = vcmp.eq.f32.partialorder %v2162_v57, 0.0  ;;  %vm898_vm8 = vcmp.eq.f32.partialorder %v2202_v34, inf }
 0x1db   :  { %v820_v26 = vmul.f32 %v1359_v8, %v2131_v16  ;;  %1121 = vst.msk [vmem:[%s2395_s7 + $0x58] sm:$0xff] %vm917_vm6, %v1081_v13  ;;  %1368 = vrsqrt.f32 %v2204_v6  ;;  %vm900_vm9 = vcmp.eq.f32.partialorder %v2202_v34, 0.0  ;;  %v901_v52 = vand.u32 2147483648, %v2202_v34 }
 0x1dc   :  { %v786_v11 = vpop.xlane.xlu1 %785  ;;  %v977_v59 = vpop.xlane.xlu0 %976  ;;  %v892_v32 = vsel %vm891_vm12, %v2125_v43, %v890_v9  ;;  %1370 = vrsqrt.f32 %v2209_v10  ;;  %vm849_vm2 = vcmp.eq.f32.partialorder %v2204_v6, inf  ;;  %vm851_vm10 = vcmp.eq.f32.partialorder %v2204_v6, 0.0 }
 0x1dd   :  { %v895_v49 = vsel %vm893_vm13, %v894_v19, %v892_v32  ;;  %v822_v15 = vsel %vm821_vm14, %v2131_v16, %v820_v26  ;;  %v1361_v50 = vpop.eup %1360  ;;  %v2243_v43 = vmax.f32 %v786_v11, 1e-12  ;;  %v2245_v23 = vmax.f32 %v977_v59, 1e-12 }
 0x1de   :  { %930 = vst.msk [vmem:[%s2394_s6 + $0x60] sm:$0xff] %vm917_vm6, %v895_v49  ;;  %v825_v39 = vsel %vm823_vm15, %v824_v37, %v822_v15  ;;  %v1363_v12 = vpop.eup %1362  ;;  %v1027_v40 = vmul.f32 %v1361_v50, %v2156_v53  ;;  %v852_v62 = vand.u32 2147483648, %v2204_v6  ;;  %vm1035_vm11 = vcmp.eq.f32.partialorder %v2209_v10, inf }
 0x1df   :  { %920 = vst.msk [vmem:[%s2394_s6 + $0x10] sm:$0xff] %vm917_vm6, %v825_v39  ;;  %v841_v42 = vmul.f32 %v1363_v12, %v2158_v17  ;;  %1372 = vrsqrt.f32 %v2243_v43  ;;  %v1038_v27 = vand.u32 2147483648, %v2209_v10  ;;  %vm1037_vm12 = vcmp.eq.f32.partialorder %v2209_v10, 0.0 }
 0x1e0   :  { %v963_v14 = vpop.xlane.xlu1 %962  ;;  %v772_v18 = vpop.xlane.xlu0 %771  ;;  %v1029_v16 = vsel %vm1028_vm0, %v2156_v53, %v1027_v40  ;;  %1374 = vrsqrt.f32 %v2245_v23  ;;  %vm905_vm13 = vcmp.eq.f32.partialorder %v2243_v43, inf  ;;  %vm907_vm14 = vcmp.eq.f32.partialorder %v2243_v43, 0.0 }
 0x1e1   :  { %v1365_v44 = vpop.eup %1364  ;;  %v2249_v46 = vmax.f32 %v963_v14, 1e-12  ;;  %v2251_v38 = vmax.f32 %v772_v18, 1e-12  ;;  %v1032_v47 = vsel %vm1030_vm1, %v1031_v28, %v1029_v16  ;;  %v843_v29 = vsel %vm842_vm3, %v2158_v17, %v841_v42 }
 0x1e2   :  { %v1083_v7 = vmul.f32 %v1365_v44, %v2162_v57  ;;  %1114 = vst.msk [vmem:[%s2395_s7 + $0x20] sm:$0xff] %vm917_vm6, %v1032_v47  ;;  %v846_v48 = vsel %vm844_vm4, %v845_v45, %v843_v29  ;;  %v1367_v53 = vpop.eup %1366  ;;  %v908_v4 = vand.u32 2147483648, %v2243_v43  ;;  %vm1091_vm15 = vcmp.eq.f32.partialorder %v2245_v23, inf }
 0x1e3   :  { %923 = vst.msk [vmem:[%s2394_s6 + $0x28] sm:$0xff] %vm917_vm6, %v846_v48  ;;  %1376 = vrsqrt.f32 %v2249_v46  ;;  %v897_v21 = vmul.f32 %v1367_v53, %v2202_v34  ;;  %vm1093_vm0 = vcmp.eq.f32.partialorder %v2245_v23, 0.0  ;;  %v1094_v11 = vand.u32 2147483648, %v2245_v23 }
 0x1e4   :  { %v788_v51 = vpop.xlane.xlu0 %787  ;;  %v1085_v22 = vsel %vm1084_vm5, %v2162_v57, %v1083_v7  ;;  %v979_v31 = vpop.xlane.xlu1 %978  ;;  %1378 = vrsqrt.f32 %v2251_v38  ;;  %vm1042_vm1 = vcmp.eq.f32.partialorder %v2249_v46, inf  ;;  %vm1044_vm3 = vcmp.eq.f32.partialorder %v2249_v46, 0.0 }
 0x1e5   :  { %v1088_v17 = vsel %vm1086_vm7, %v1087_v5, %v1085_v22  ;;  %v1369_v24 = vpop.eup %1368  ;;  %v2281_v55 = vmax.f32 %v979_v31, 1e-12  ;;  %v899_v60 = vsel %vm898_vm8, %v2202_v34, %v897_v21  ;;  %v2285_v36 = vmax.f32 %v788_v51, 1e-12 }
 0x1e6   :  { %1122 = vst.msk [vmem:[%s2395_s7 + $0x60] sm:$0xff] %vm917_vm6, %v1088_v17  ;;  %v1371_v57 = vpop.eup %1370  ;;  %v848_v25 = vmul.f32 %v1369_v24, %v2204_v6  ;;  %v902_v30 = vsel %vm900_vm9, %v901_v52, %v899_v60  ;;  %v1045_v26 = vand.u32 2147483648, %v2249_v46  ;;  %vm856_vm4 = vcmp.eq.f32.partialorder %v2251_v38, inf }
 0x1e7   :  { %v1034_v63 = vmul.f32 %v1371_v57, %v2209_v10  ;;  %1380 = vrsqrt.f32 %v2281_v55  ;;  %931 = vst.msk [vmem:[%s2394_s6 + $0x68] sm:$0xff] %vm917_vm6, %v902_v30  ;;  %v859_v37 = vand.u32 2147483648, %v2251_v38  ;;  %vm858_vm5 = vcmp.eq.f32.partialorder %v2251_v38, 0.0 }
 0x1e8   :  { %v965_v58 = vpop.xlane.xlu0 %964  ;;  %v850_v41 = vsel %vm849_vm2, %v2204_v6, %v848_v25  ;;  %1382 = vrsqrt.f32 %v2285_v36  ;;  %vm1098_vm7 = vcmp.eq.f32.partialorder %v2281_v55, inf  ;;  %v1101_v40 = vand.u32 2147483648, %v2281_v55 }
 0x1e9   :  { %v2287_v61 = vmax.f32 %v965_v58, 1e-12  ;;  %v853_v1 = vsel %vm851_vm10, %v852_v62, %v850_v41  ;;  %v1036_v2 = vsel %vm1035_vm11, %v2209_v10, %v1034_v63  ;;  %v1373_v35 = vpop.eup %1372  ;;  %vm1100_vm8 = vcmp.eq.f32.partialorder %v2281_v55, 0.0 }
 0x1ea   :  { %924 = vst.msk [vmem:[%s2394_s6 + $0x30] sm:$0xff] %vm917_vm6, %v853_v1  ;;  %v1039_v56 = vsel %vm1037_vm12, %v1038_v27, %v1036_v2  ;;  %v904_v3 = vmul.f32 %v1373_v35, %v2243_v43  ;;  %v1375_v20 = vpop.eup %1374  ;;  %vm912_vm9 = vcmp.eq.f32.partialorder %v2285_v36, inf  ;;  %vm914_vm2 = vcmp.eq.f32.partialorder %v2285_v36, 0.0 }
 0x1eb   :  { %1384 = vrsqrt.f32 %v2287_v61  ;;  %1115 = vst.msk [vmem:[%s2395_s7 + $0x28] sm:$0xff] %vm917_vm6, %v1039_v56  ;;  %v1090_v8 = vmul.f32 %v1375_v20, %v2245_v23  ;;  %vm1049_vm10 = vcmp.eq.f32.partialorder %v2287_v61, inf  ;;  %vm1051_vm11 = vcmp.eq.f32.partialorder %v2287_v61, 0.0 }
 0x1ec   :  { %v981_v54 = vpop.xlane.xlu0 %980  ;;  %v906_v6 = vsel %vm905_vm13, %v2243_v43, %v904_v3  ;;  %v915_v43 = vand.u32 2147483648, %v2285_v36 }
 0x1ed   :  { %v2314_v0 = vmax.f32 %v981_v54, 1e-12  ;;  %v1377_v34 = vpop.eup %1376  ;;  %v909_v10 = vsel %vm907_vm14, %v908_v4, %v906_v6  ;;  %v1092_v19 = vsel %vm1091_vm15, %v2245_v23, %v1090_v8 }
 0x1ee   :  { %v1379_v9 = vpop.eup %1378  ;;  %v1041_v33 = vmul.f32 %v1377_v34, %v2249_v46  ;;  %932 = vst.msk [vmem:[%s2394_s6 + $0x70] sm:$0xff] %vm917_vm6, %v909_v10  ;;  %v1095_v13 = vsel %vm1093_vm0, %v1094_v11, %v1092_v19 }
 0x1ef   :  { %1386 = vrsqrt.f32 %v2314_v0  ;;  %v855_v59 = vmul.f32 %v1379_v9, %v2251_v38  ;;  %1123 = vst.msk [vmem:[%s2395_s7 + $0x68] sm:$0xff] %vm917_vm6, %v1095_v13  ;;  %vm1105_vm12 = vcmp.eq.f32.partialorder %v2314_v0, inf  ;;  %v1108_v48 = vand.u32 2147483648, %v2314_v0 }
 0x1f0   :  { %v1043_v32 = vsel %vm1042_vm1, %v2249_v46, %v1041_v33  ;;  %v1052_v46 = vand.u32 2147483648, %v2287_v61  ;;  %vm1107_vm13 = vcmp.eq.f32.partialorder %v2314_v0, 0.0 }
 0x1f1   :  { %v1381_v49 = vpop.eup %1380  ;;  %v1046_v15 = vsel %vm1044_vm3, %v1045_v26, %v1043_v32  ;;  %v857_v50 = vsel %vm856_vm4, %v2251_v38, %v855_v59 }
 0x1f2   :  { %v1383_v39 = vpop.eup %1382  ;;  %1116 = vst.msk [vmem:[%s2395_s7 + $0x30] sm:$0xff] %vm917_vm6, %v1046_v15  ;;  %v860_v14 = vsel %vm858_vm5, %v859_v37, %v857_v50  ;;  %v1097_v12 = vmul.f32 %v1381_v49, %v2281_v55 }
 0x1f3   :  { %925 = vst.msk [vmem:[%s2394_s6 + $0x38] sm:$0xff] %vm917_vm6, %v860_v14  ;;  %v911_v28 = vmul.f32 %v1383_v39, %v2285_v36 }
 0x1f4   :  { %v1099_v42 = vsel %vm1098_vm7, %v2281_v55, %v1097_v12 }
 0x1f5   :  { %v1385_v18 = vpop.eup %1384  ;;  %v1102_v23 = vsel %vm1100_vm8, %v1101_v40, %v1099_v42  ;;  %v913_v44 = vsel %vm912_vm9, %v2285_v36, %v911_v28 }
 0x1f6   :  { %v1048_v16 = vmul.f32 %v1385_v18, %v2287_v61  ;;  %1124 = vst.msk [vmem:[%s2395_s7 + $0x70] sm:$0xff] %vm917_vm6, %v1102_v23  ;;  %v916_v45 = vsel %vm914_vm2, %v915_v43, %v913_v44 }
 0x1f7   :  { %933 = vst.msk [vmem:[%s2394_s6 + $0x78] sm:$0xff] %vm917_vm6, %v916_v45 }
 0x1f8   :  { %v1050_v47 = vsel %vm1049_vm10, %v2287_v61, %v1048_v16 }
 0x1f9   :  { %v1387_v38 = vpop.eup %1386  ;;  %v1053_v29 = vsel %vm1051_vm11, %v1052_v46, %v1050_v47 }
 0x1fa   :  { %v1104_v7 = vmul.f32 %v1387_v38, %v2314_v0  ;;  %1117 = vst.msk [vmem:[%s2395_s7 + $0x38] sm:$0xff] %vm917_vm6, %v1053_v29 }
 0x1fc   :  { %v1106_v5 = vsel %vm1105_vm12, %v2314_v0, %v1104_v7 }
 0x1fd   :  { %v1109_v51 = vsel %vm1107_vm13, %v1108_v48, %v1106_v5 }
 0x1fe   :  { %1125 = vst.msk [vmem:[%s2395_s7 + $0x78] sm:$0xff] %vm917_vm6, %v1109_v51 }

</bundles_post_ra>
